<compile_context>
chip_gen: v5e
topology: v5e:2x2
jax: 0.10.0
libtpu: 0.0.40
codegen_flags: <defaults>
</compile_context>

<pallas_src>
import functools
from typing import Any, NamedTuple, Tuple

import jax
import jax.numpy as jnp
from jax.experimental import pallas as pl
from jax.experimental.pallas import tpu as pltpu

_LANE = 128     # vreg lane width   (last dim)
_SUBLANE = 8    # vreg sublane width (second-last dim)


def _round_up(n, m):
    return ((n + m - 1) // m) * m


def _pick_batch_tile(batch):
    """Sublane-aligned batch tile: >=2 grid steps when the batch allows (feeds both
    v7x TensorCores), capped at 256 rows (amortizes per-step overhead, bounds the
    per-tile activation footprint)."""
    if batch <= _SUBLANE:
        return _SUBLANE
    tm = _round_up(-(-batch // 2), _SUBLANE)   # ceil(batch/2), sublane aligned
    return min(tm, 256)


def _fused_mlp_kernel(x_ref, *refs, num_layers, mxu_dtype):
    """Run the whole MLP on one (tm, D) batch tile; intermediates never leave VMEM."""
    out_ref = refs[-1]
    wb = refs[:-1]                       # w0, b0, w1, b1, ..., w_{L-1}, b_{L-1}
    h = x_ref[...]                       # already mxu_dtype (bf16) from the wrapper
    for l in range(num_layers):
        w = wb[2 * l][...]               # (pdi, pdo) bf16 MXU operand
        b = wb[2 * l + 1][...]           # (1, pdo) f32, broadcasts over rows
        # bf16 x bf16 -> f32 accumulation on the MXU.
        h = jnp.dot(h, w, preferred_element_type=jnp.float32) + b
        if l < num_layers - 1:
            h = jnp.tanh(h)              # f32 elementwise (v5e VPU/EUP have no bf16)
            h = h.astype(mxu_dtype)      # cast only at the next MXU input
    # Dropout(rate=0) == identity; postprocessing == identity.
    out_ref[...] = h.astype(out_ref.dtype)


class PreparedMLP(NamedTuple):
    padded: Tuple          # ((w_p, b_p), ...) lane-dense, w in bf16, b in f32
    dims: Tuple[int, ...]  # logical layer sizes (d_in, h1, ..., d_out)
    pdims: Tuple[int, ...] # lane-padded layer sizes
    mxu_dtype: Any


def prepare_params(params, mxu_dtype=jnp.bfloat16):
    """Pad + cast ONCE at init (hoisted out of the forward path).

    Zero padding is exact: padded weight rows/cols and biases are 0, tanh(0)=0, and
    padded activation columns only feed zero weight rows downstream."""
    dims = (params[0][0].shape[0],) + tuple(w.shape[1] for w, _ in params)
    pdims = tuple(_round_up(d, _LANE) for d in dims)
    padded = []
    for l, (w, b) in enumerate(params):
        di, do = w.shape
        pdi, pdo = pdims[l], pdims[l + 1]
        w_p = jnp.zeros((pdi, pdo), mxu_dtype).at[:di, :do].set(w.astype(mxu_dtype))
        b_p = jnp.zeros((1, pdo), jnp.float32).at[0, :do].set(b.astype(jnp.float32))
        padded.append((w_p, b_p))
    return PreparedMLP(tuple(padded), dims, pdims, mxu_dtype)


def base_mlp_forward(x, prepared: PreparedMLP, dropout_rate=0.0):
    """Mirror BaseMLP.forward (dropout_rate=0 -> identity, identity postprocessing)."""
    assert dropout_rate == 0.0, "training-mode dropout not implemented"
    batch, d_in = x.shape
    assert d_in == prepared.dims[0]
    num_layers = len(prepared.padded)
    pdims = prepared.pdims
    mxu_dtype = prepared.mxu_dtype
    out_dtype = jnp.float32

    # ---- batch tiling (sublane-aligned; grid axis is megacore-parallel) ----
    tm = _pick_batch_tile(batch)
    pb = _round_up(batch, tm)

    # Pad/cast the input only when needed (skip the copy when already aligned & bf16).
    if (pb, pdims[0]) == (batch, d_in) and x.dtype == mxu_dtype:
        x_p = x
    else:
        x_p = jnp.zeros((pb, pdims[0]), mxu_dtype).at[:batch, :d_in].set(
            x.astype(mxu_dtype))

    in_specs = [pl.BlockSpec((tm, pdims[0]), lambda i: (i, 0))]
    flat_wb = []
    for w_p, b_p in prepared.padded:
        flat_wb += [w_p, b_p]
        # Grid-invariant index_map -> weights/biases stay VMEM-resident across tiles.
        in_specs += [pl.BlockSpec(w_p.shape, lambda i: (0, 0)),
                     pl.BlockSpec(b_p.shape, lambda i: (0, 0))]

    # ---- explicit VMEM budget (default scoped limit is only 16/32 MiB) ----
    weight_bytes = sum(w.size * w.dtype.itemsize + b.size * b.dtype.itemsize
                       for w, b in prepared.padded)
    io_tile_bytes = tm * pdims[0] * x_p.dtype.itemsize + tm * pdims[-1] * 4
    act_bytes = tm * max(pdims) * (4 + 2)              # widest f32 h + its bf16 copy
    vmem_bytes = 2 * weight_bytes + 2 * io_tile_bytes + act_bytes  # 2x: double buffers
    vmem_bytes = int(vmem_bytes * 1.5) + (2 << 20)                 # ~50% headroom
    vmem_bytes = min(max(vmem_bytes, 32 << 20), 64 << 20)          # 64 MiB = v7x ceiling

    # ---- advisory cost estimate for the XLA scheduler ----
    flops = 2 * pb * sum(pdims[l] * pdims[l + 1] for l in range(num_layers))
    transcendentals = pb * sum(pdims[1:-1])
    bytes_accessed = (x_p.size * x_p.dtype.itemsize + weight_bytes
                      + pb * pdims[-1] * 4)

    out_p = pl.pallas_call(
        functools.partial(_fused_mlp_kernel, num_layers=num_layers,
                          mxu_dtype=mxu_dtype),
        out_shape=jax.ShapeDtypeStruct((pb, pdims[-1]), out_dtype),
        grid=(pb // tm,),
        in_specs=in_specs,
        out_specs=pl.BlockSpec((tm, pdims[-1]), lambda i: (i, 0)),
        compiler_params=pltpu.CompilerParams(
            dimension_semantics=("parallel",),
            vmem_limit_bytes=vmem_bytes),
        cost_estimate=pl.CostEstimate(flops=flops,
                                      transcendentals=transcendentals,
                                      bytes_accessed=bytes_accessed),
    )(x_p, *flat_wb)

    return out_p[:batch, :prepared.dims[-1]]


def init_params(key, layer_sizes):
    """PyTorch nn.Linear-style init: U(-1/sqrt(fan_in), 1/sqrt(fan_in))."""
    params = []
    for i in range(len(layer_sizes) - 1):
        fan_in, fan_out = layer_sizes[i], layer_sizes[i + 1]
        key, kw, kb = jax.random.split(key, 3)
        bound = 1.0 / jnp.sqrt(fan_in)
        # stored as (in, out) == transposed PyTorch (out, in) weight
        w = jax.random.uniform(kw, (fan_in, fan_out), jnp.float32, -bound, bound)
        b = jax.random.uniform(kb, (fan_out,), jnp.float32, -bound, bound)
        params.append((w, b))
    return params


def base_mlp_reference(x, params, operand_dtype=None):
    """Pure-JAX reference.  With operand_dtype=bf16 it emulates the kernel's numerics
    (bf16 MXU operands, f32 accumulation/elementwise)."""
    def q(v):
        if operand_dtype is not None:
            return v.astype(operand_dtype).astype(jnp.float32)
        return v
    h = q(x)
    for l, (w, b) in enumerate(params):
        h = h @ q(w) + b
        if l < len(params) - 1:
            h = q(jnp.tanh(h))
    return h


if __name__ == "__main__":
    layer_sizes = [16, 32, 32, 8]
    batch = 8

    key = jax.random.PRNGKey(0)
    key, kx = jax.random.split(key)
    x = jax.random.normal(kx, (batch, layer_sizes[0]), dtype=jnp.float32)
    params = init_params(key, layer_sizes)

    # Padding / bf16 cast done ONCE here, outside the forward path.
    prepared = prepare_params(params)

    out = base_mlp_forward(x, prepared)
    out = jax.block_until_ready(out)

    assert out.shape == (batch, layer_sizes[-1])

    # Tight check against a reference emulating the kernel's bf16-operand/f32-accum math.
    ref_bf16 = base_mlp_reference(x, params, operand_dtype=jnp.bfloat16)
    assert jnp.allclose(out, ref_bf16, atol=1e-2, rtol=1e-2)

    # Loose sanity check against the plain f32 reference (bf16 operands -> ~1e-2 error).
    ref_f32 = base_mlp_reference(x, params)
    assert jnp.allclose(out, ref_f32, atol=2e-1, rtol=1e-1)

    print("KERNEL_OK")
</pallas_src>

<mosaic_0001>
module attributes {stable_mosaic.version = 11 : i64} {
  func.func @_fused_mlp_kernel(%arg0: i32, %arg1: memref<8x128xbf16, #tpu.memory_space<vmem>>, %arg2: memref<128x128xbf16, #tpu.memory_space<vmem>>, %arg3: memref<1x128xf32, #tpu.memory_space<vmem>>, %arg4: memref<128x128xbf16, #tpu.memory_space<vmem>>, %arg5: memref<1x128xf32, #tpu.memory_space<vmem>>, %arg6: memref<128x128xbf16, #tpu.memory_space<vmem>>, %arg7: memref<1x128xf32, #tpu.memory_space<vmem>>, %arg8: memref<8x128xf32, #tpu.memory_space<vmem>>) attributes {dimension_semantics = [#tpu.dimension_semantics<parallel>], iteration_bounds = array<i64: 1>, scalar_prefetch = 0 : i64, scratch_operands = 0 : i64, tpu.core_type = #tpu.core_type<tc>, window_params = [{transform_indices = @transform_0, window_bounds = array<i64: 8, 128>}, {pipeline_mode = #tpu.pipeline_mode<synchronous>, transform_indices = @transform_1, window_bounds = array<i64: 128, 128>}, {pipeline_mode = #tpu.pipeline_mode<synchronous>, transform_indices = @transform_2, window_bounds = array<i64: 1, 128>}, {pipeline_mode = #tpu.pipeline_mode<synchronous>, transform_indices = @transform_3, window_bounds = array<i64: 128, 128>}, {pipeline_mode = #tpu.pipeline_mode<synchronous>, transform_indices = @transform_4, window_bounds = array<i64: 1, 128>}, {pipeline_mode = #tpu.pipeline_mode<synchronous>, transform_indices = @transform_5, window_bounds = array<i64: 128, 128>}, {pipeline_mode = #tpu.pipeline_mode<synchronous>, transform_indices = @transform_6, window_bounds = array<i64: 1, 128>}, {transform_indices = @transform_7, window_bounds = array<i64: 8, 128>}]} {
    %c0 = arith.constant 0 : index
    %c0_0 = arith.constant 0 : index
    %0 = vector.load %arg1[%c0, %c0_0] : memref<8x128xbf16, #tpu.memory_space<vmem>>, vector<8x128xbf16>
    %c0_1 = arith.constant 0 : index
    %c0_2 = arith.constant 0 : index
    %1 = vector.load %arg2[%c0_1, %c0_2] : memref<128x128xbf16, #tpu.memory_space<vmem>>, vector<128x128xbf16>
    %c0_3 = arith.constant 0 : index
    %c0_4 = arith.constant 0 : index
    %2 = vector.load %arg3[%c0_3, %c0_4] : memref<1x128xf32, #tpu.memory_space<vmem>>, vector<1x128xf32>
    %cst = arith.constant dense<0.000000e+00> : vector<8x128xf32>
    %3 = tpu.matmul %0, %1, %cst {dimension_numbers = #tpu.dot_dimension_numbers<[1], [0], [0], [1], [0, 0, 1, 1], [], []>} : vector<8x128xbf16>, vector<128x128xbf16>, vector<8x128xf32> -> vector<8x128xf32>
    %4 = vector.broadcast %2 : vector<1x128xf32> to vector<8x128xf32>
    %5 = arith.addf %3, %4 : vector<8x128xf32>
    %6 = math.tanh %5 : vector<8x128xf32>
    %7 = arith.truncf %6 : vector<8x128xf32> to vector<8x128xbf16>
    %c0_5 = arith.constant 0 : index
    %c0_6 = arith.constant 0 : index
    %8 = vector.load %arg4[%c0_5, %c0_6] : memref<128x128xbf16, #tpu.memory_space<vmem>>, vector<128x128xbf16>
    %c0_7 = arith.constant 0 : index
    %c0_8 = arith.constant 0 : index
    %9 = vector.load %arg5[%c0_7, %c0_8] : memref<1x128xf32, #tpu.memory_space<vmem>>, vector<1x128xf32>
    %cst_9 = arith.constant dense<0.000000e+00> : vector<8x128xf32>
    %10 = tpu.matmul %7, %8, %cst_9 {dimension_numbers = #tpu.dot_dimension_numbers<[1], [0], [0], [1], [0, 0, 1, 1], [], []>} : vector<8x128xbf16>, vector<128x128xbf16>, vector<8x128xf32> -> vector<8x128xf32>
    %11 = vector.broadcast %9 : vector<1x128xf32> to vector<8x128xf32>
    %12 = arith.addf %10, %11 : vector<8x128xf32>
    %13 = math.tanh %12 : vector<8x128xf32>
    %14 = arith.truncf %13 : vector<8x128xf32> to vector<8x128xbf16>
    %c0_10 = arith.constant 0 : index
    %c0_11 = arith.constant 0 : index
    %15 = vector.load %arg6[%c0_10, %c0_11] : memref<128x128xbf16, #tpu.memory_space<vmem>>, vector<128x128xbf16>
    %c0_12 = arith.constant 0 : index
    %c0_13 = arith.constant 0 : index
    %16 = vector.load %arg7[%c0_12, %c0_13] : memref<1x128xf32, #tpu.memory_space<vmem>>, vector<1x128xf32>
    %cst_14 = arith.constant dense<0.000000e+00> : vector<8x128xf32>
    %17 = tpu.matmul %14, %15, %cst_14 {dimension_numbers = #tpu.dot_dimension_numbers<[1], [0], [0], [1], [0, 0, 1, 1], [], []>} : vector<8x128xbf16>, vector<128x128xbf16>, vector<8x128xf32> -> vector<8x128xf32>
    %18 = vector.broadcast %16 : vector<1x128xf32> to vector<8x128xf32>
    %19 = arith.addf %17, %18 : vector<8x128xf32>
    %c0_15 = arith.constant 0 : index
    %c0_16 = arith.constant 0 : index
    %20 = vector.load %arg8[%c0_15, %c0_16] : memref<8x128xf32, #tpu.memory_space<vmem>>, vector<8x128xf32>
    tpu.vector_store %arg8[%c0_15, %c0_16], %19 {strides = array<i32>} : memref<8x128xf32, #tpu.memory_space<vmem>>, vector<8x128xf32>,
    return
  }
  func.func @transform_0(%arg0: i32) -> (i32, i32) {
    %c0_i32 = arith.constant 0 : i32
    %c0_i32_0 = arith.constant 0 : i32
    return %arg0, %c0_i32 : i32, i32
  }
  func.func @transform_1(%arg0: i32) -> (i32, i32) {
    %c0_i32 = arith.constant 0 : i32
    %c0_i32_0 = arith.constant 0 : i32
    %c0_i32_1 = arith.constant 0 : i32
    return %c0_i32, %c0_i32_0 : i32, i32
  }
  func.func @transform_2(%arg0: i32) -> (i32, i32) {
    %c0_i32 = arith.constant 0 : i32
    %c0_i32_0 = arith.constant 0 : i32
    %c0_i32_1 = arith.constant 0 : i32
    return %c0_i32, %c0_i32_0 : i32, i32
  }
  func.func @transform_3(%arg0: i32) -> (i32, i32) {
    %c0_i32 = arith.constant 0 : i32
    %c0_i32_0 = arith.constant 0 : i32
    %c0_i32_1 = arith.constant 0 : i32
    return %c0_i32, %c0_i32_0 : i32, i32
  }
  func.func @transform_4(%arg0: i32) -> (i32, i32) {
    %c0_i32 = arith.constant 0 : i32
    %c0_i32_0 = arith.constant 0 : i32
    %c0_i32_1 = arith.constant 0 : i32
    return %c0_i32, %c0_i32_0 : i32, i32
  }
  func.func @transform_5(%arg0: i32) -> (i32, i32) {
    %c0_i32 = arith.constant 0 : i32
    %c0_i32_0 = arith.constant 0 : i32
    %c0_i32_1 = arith.constant 0 : i32
    return %c0_i32, %c0_i32_0 : i32, i32
  }
  func.func @transform_6(%arg0: i32) -> (i32, i32) {
    %c0_i32 = arith.constant 0 : i32
    %c0_i32_0 = arith.constant 0 : i32
    %c0_i32_1 = arith.constant 0 : i32
    return %c0_i32, %c0_i32_0 : i32, i32
  }
  func.func @transform_7(%arg0: i32) -> (i32, i32) {
    %c0_i32 = arith.constant 0 : i32
    %c0_i32_0 = arith.constant 0 : i32
    return %arg0, %c0_i32 : i32, i32
  }
}

</mosaic_0001>

<bundles_post_ra>
// kernel: tpu_custom_call.1
= control target key start
LH: loop header
LB: loop body
LE: loop exit
PB: predicated region body
PF: predicated region fallthrough
CT: control target
= control target key end

     0   :  { %12 = vsyncpa [#allocation3], 0  ;;  %s689_s0 = inlined_call_operand.hbm [shape: bf16[8,128], index: 0, kind: input, shape index: {}]   ;;  %s690_s1 = inlined_call_operand.hbm [shape: bf16[128,128], index: 1, kind: input, shape index: {}]   ;;  %s691_s2 = inlined_call_operand.vmem [shape: f32[1,128], index: 2, kind: input, shape index: {}]   ;;  %s692_s3 = inlined_call_operand.hbm [shape: bf16[128,128], index: 3, kind: input, shape index: {}]   ;;  %s693_s4 = inlined_call_operand.vmem [shape: f32[1,128], index: 4, kind: input, shape index: {}]   ;;  %s694_s5 = inlined_call_operand.hbm [shape: bf16[128,128], index: 5, kind: input, shape index: {}]   ;;  %s695_s6 = inlined_call_operand.vmem [shape: f32[1,128], index: 6, kind: input, shape index: {}]   ;;  %s696_s7 = inlined_call_operand.hbm [shape: f32[8,128], index: 7, kind: output, shape index: {}]  }
   0x1   :  { %13 = vsyncpa [#allocation6], 0 }
   0x2   :  { %14 = vsyncpa [#allocation9], 0  ;;  %s31_s26 = sshll.u32 %s690_s1, 4  ;;  %s32_s26 = int_to_ptr.hbm [resolvable:$true] %s31_s26 }
   0x3   :  { %15 = vsyncpa [#allocation4], 0  ;;  %s618_s27 = smov [#allocation5]   ;;  %s21_s8 = sshll.u32 %s689_s0, 4  ;;  %s22_s8 = int_to_ptr.hbm [resolvable:$true] %s21_s8 }
   0x4   :  { %s33_s28 = sshll.u32 %s618_s27, 4  ;;  %s619_s9 = smov 64   ;;  %s34_s28 = int_to_ptr.vmem [resolvable:$true] %s33_s28 }
   0x5   :  { %s620_s10 = smov 4   ;;  %s621_s11 = smov [#allocation2]  }
   0x6   :  { %39 = dma.hbm_to_vmem [thread:$0]  %s32_s26, 1024, %s34_s28, [#allocation6], %s619_s9, %s619_s9, %s620_s10  }
   0x7   :  { %s23_s12 = sshll.u32 %s621_s11, 4  ;;  %s46_s15 = sshll.u32 %s692_s3, 4  ;;  %s24_s12 = int_to_ptr.vmem [resolvable:$true] %s23_s12  ;;  %s47_s15 = int_to_ptr.hbm [resolvable:$true] %s46_s15 }
   0x8   :  { %26 = dma.hbm_to_vmem [thread:$0]  %s22_s8, 64, %s24_s12, [#allocation3]  }
   0x9   :  { %s61_s17 = sshll.u32 %s694_s5, 4  ;;  %s622_s18 = smov [#allocation7]   ;;  %s62_s17 = int_to_ptr.hbm [resolvable:$true] %s61_s17 }
   0xa   :  { %s48_s19 = sshll.u32 %s622_s18, 4  ;;  %s623_s0 = smov [#allocation8]   ;;  %s49_s19 = int_to_ptr.vmem [resolvable:$true] %s48_s19 }
   0xb   :  { %54 = dma.hbm_to_vmem [thread:$0]  %s47_s15, 1024, %s49_s19, [#allocation6], %s619_s9, %s619_s9, %s620_s10  }
   0xc   :  { %s63_s20 = sshll.u32 %s623_s0, 4  ;;  %s64_s20 = int_to_ptr.vmem [resolvable:$true] %s63_s20 }
   0xd   :  { %69 = dma.hbm_to_vmem [thread:$0]  %s62_s17, 1024, %s64_s20, [#allocation9], %s619_s9, %s619_s9, %s620_s10  }
   0xe   :  { %610 = dma.done.wait [#allocation3], 64  }
   0xf   :  { %611 = vsyncadd [#allocation3], 4294967232 }
  0x10   :  { %612 = dma.done.wait [#allocation6], 2048  }
  0x11   :  { %613 = vsyncadd [#allocation6], 4294965248 }
  0x12   :  { %614 = dma.done.wait [#allocation9], 1024  }
  0x13   :  { %615 = vsyncadd [#allocation9], 4294966272  ;;  %v459_v0 = vld [vmem:[#allocation5 + $0x38] sm:$0xff]  ;;  %v458_v1 = vld [vmem:[#allocation5 + $0x30] sm:$0xff]  ;;  %s624_s24 = smov [#allocation10]   ;;  %s344_s28 = sshll.u32 %s696_s7, 4  ;;  %s345_s28 = int_to_ptr.hbm [resolvable:$true] %s344_s28 }
  0x14   :  { %157 = vmatpush.bf16.msra.mxu0 %v459_v0  ;;  %v467_v2 = vld [vmem:[#allocation7 + $0x38] sm:$0xff]  ;;  %v466_v3 = vld [vmem:[#allocation7 + $0x30] sm:$0xff]  ;;  %v457_v4 = vld [vmem:[#allocation5 + $0x28] sm:$0xff]  ;;  %s342_s25 = sshll.u32 %s624_s24, 4  ;;  %s343_s25 = int_to_ptr.vmem [resolvable:$true] %s342_s25 }
  0x15   :  { %240 = vmatpush.bf16.msra.mxu1 %v467_v2  ;;  %v465_v5 = vld [vmem:[#allocation7 + $0x28] sm:$0xff]  ;;  %v456_v6 = vld [vmem:[#allocation5 + $0x20] sm:$0xff]  ;;  %v455_v8 = vld [vmem:[#allocation5 + $0x18] sm:$0xff] }
  0x16   :  { %v464_v7 = vld [vmem:[#allocation7 + $0x20] sm:$0xff]  ;;  %v463_v9 = vld [vmem:[#allocation7 + $0x18] sm:$0xff]  ;;  %v454_v10 = vld [vmem:[#allocation5 + $0x10] sm:$0xff] }
  0x17   :  { %v453_v11 = vld [vmem:[#allocation5 + $0x8] sm:$0xff]  ;;  %v452_v12 = vld [vmem:[#allocation5] sm:$0xff]  ;;  %v88_v13 = vld [vmem:[#allocation2] sm:$0xf] }
  0x18   :  { %158 = vmatpush.bf16.msra.mxu0 %v458_v1  ;;  %v462_v14 = vld [vmem:[#allocation7 + $0x10] sm:$0xff]  ;;  %v461_v15 = vld [vmem:[#allocation7 + $0x8] sm:$0xff]  ;;  %v460_v16 = vld [vmem:[#allocation7] sm:$0xff] }
  0x19   :  { %241 = vmatpush.bf16.msra.mxu1 %v466_v3  ;;  %v475_v17 = vld [vmem:[#allocation8 + $0x38] sm:$0xff]  ;;  %v474_v18 = vld [vmem:[#allocation8 + $0x30] sm:$0xff]  ;;  %v473_v19 = vld [vmem:[#allocation8 + $0x28] sm:$0xff] }
  0x1a   :  { %323 = vmatpush.bf16.msra.mxu2 %v475_v17  ;;  %v472_v20 = vld [vmem:[#allocation8 + $0x20] sm:$0xff]  ;;  %v471_v21 = vld [vmem:[#allocation8 + $0x18] sm:$0xff]  ;;  %v470_v28 = vld [vmem:[#allocation8 + $0x10] sm:$0xff] }
  0x1b   :  { %v483_v22 = vld [vmem:[%s691_s2] ss:$0 sm:$0xff]  ;;  %v469_v29 = vld [vmem:[#allocation8 + $0x8] sm:$0xff]  ;;  %v468_v30 = vld [vmem:[#allocation8] sm:$0xff] }
  0x1c   :  { %159 = vmatpush.bf16.msra.mxu0 %v457_v4  ;;  %v484_v31 = vld [vmem:[%s693_s4] ss:$0 sm:$0xff] }
  0x1d   :  { %242 = vmatpush.bf16.msra.mxu1 %v465_v5  ;;  %v485_v37 = vld [vmem:[%s695_s6] ss:$0 sm:$0xff] }
  0x1e   :  { %324 = vmatpush.bf16.msra.mxu2 %v474_v18 }
  0x20   :  { %160 = vmatpush.bf16.msra.mxu0 %v456_v6 }
  0x21   :  { %243 = vmatpush.bf16.msra.mxu1 %v464_v7 }
  0x22   :  { %325 = vmatpush.bf16.msra.mxu2 %v473_v19 }
  0x24   :  { %161 = vmatpush.bf16.msra.mxu0 %v455_v8 }
  0x25   :  { %244 = vmatpush.bf16.msra.mxu1 %v463_v9 }
  0x26   :  { %326 = vmatpush.bf16.msra.mxu2 %v472_v20 }
  0x28   :  { %162 = vmatpush.bf16.msra.mxu0 %v454_v10 }
  0x29   :  { %245 = vmatpush.bf16.msra.mxu1 %v462_v14 }
  0x2a   :  { %327 = vmatpush.bf16.msra.mxu2 %v471_v21 }
  0x2c   :  { %163 = vmatpush.bf16.msra.mxu0 %v453_v11 }
  0x2d   :  { %246 = vmatpush.bf16.msra.mxu1 %v461_v15 }
  0x2e   :  { %328 = vmatpush.bf16.msra.mxu2 %v470_v28 }
  0x30   :  { %164 = vmatpush.bf16.msra.mxu0 %v452_v12 }
  0x31   :  { %247 = vmatpush.bf16.msra.mxu1 %v460_v16 }
  0x32   :  { %329 = vmatpush.bf16.msra.mxu2 %v469_v29 }
  0x33   :  { %165 = vmatmul.bf16.vlgmr.msra.gmra.mxu0 %v88_v13 }
  0x36   :  { %330 = vmatpush.bf16.msra.mxu2 %v468_v30 }
  0xb0   :  { %v166_v23 = vpop.f32.mrf.mxu0 }
  0xb1   :  { %v167_v24 = vadd.f32 %v483_v22, %v166_v23 }
  0xb3   :  { %486 = vtanh.f32 %v167_v24 }
  0xb8   :  { %v168_v25 = vpop.f32.mrf.mxu0 }
  0xb9   :  { %v487_v26 = vpop.eup %486 }
  0xba   :  { %v171_v27 = vpack.c.bf16 %v487_v26, %v487_v26 }
  0xbc   :  { %248 = vmatmul.bf16.vlgmr.msra.gmra.mxu1 %v171_v27 }
 0x139   :  { %v249_v32 = vpop.f32.mrf.mxu1 }
 0x13a   :  { %v250_v33 = vadd.f32 %v484_v31, %v249_v32 }
 0x13c   :  { %488 = vtanh.f32 %v250_v33 }
 0x141   :  { %v251_v34 = vpop.f32.mrf.mxu1 }
 0x142   :  { %v489_v35 = vpop.eup %488 }
 0x143   :  { %v254_v36 = vpack.c.bf16 %v489_v35, %v489_v35 }
 0x145   :  { %331 = vmatmul.bf16.vlgmr.msra.gmra.mxu2 %v254_v36 }
 0x1c8   :  { %v332_v38 = vpop.f32.mrf.mxu2 }
 0x1c9   :  { %v333_v39 = vadd.f32 %v485_v37, %v332_v38 }
 0x1cb   :  { %336 = vst [vmem:[#allocation10] sm:$0xff] %v333_v39 }
 0x1cc   :  { %347 = dma.vmem_to_hbm [thread:$0]  %s343_s25, 128, %s345_s28, [#allocation4]  }
 0x1d0   :  { %v334_v40 = vpop.f32.mrf.mxu2 }
 0x1d1   :  { %616 = dma.done.wait [#allocation4], 128  }
 0x1d2   :  { %617 = vsyncadd [#allocation4], 4294967168 }
 0x1d3   :  { %352 = vsyncpa [#allocation3], 1 }
 0x1d4   :  { %353 = vsyncpa [#allocation6], 1 }
 0x1d5   :  { %354 = vsyncpa [#allocation9], 1 }
 0x1d6   :  { %355 = vsyncpa [#allocation4], 1 }

</bundles_post_ra>
